<compile_context>
chip_gen: v7x
topology: tpu7x:2x2x1
jax: 0.10.0
libtpu: 0.0.40
codegen_flags: <defaults>
</compile_context>

<pallas_src>
import numpy as np
import jax
import jax.numpy as jnp
from jax.experimental import pallas as pl
from jax.experimental.pallas import tpu as pltpu

LANE = 128            # vreg lane width
ALIGN = 16            # row alignment safe for both f32 (8,128) and bf16 (16,128) tiles
MAX_BATCH_BLOCK = 1024


def _round_up(x, m):
    return ((x + m - 1) // m) * m


def _num_tensorcores():
    """Best-effort TensorCores-per-device (v7x exposes 2; v5e/v6e expose 1)."""
    try:
        kind = jax.devices()[0].device_kind.lower()
    except Exception:
        return 1
    return 2 if "v7" in kind else 1


def make_recurrent_network(isize, hsizes, nbactions, rec_layer_in, rec_layer_out,
                           sf=True, batch_block=None):
    """Builds a fused, batched, multi-step Pallas forward for RecurrentNetwork."""
    hsizes = list(hsizes)
    n_layers = len(hsizes) + 1                       # networksize
    inputsizes = [isize] + hsizes
    outputsizes = hsizes + [nbactions]
    rec_size = inputsizes[rec_layer_out]

    # Config checks: the rec output must be produced inside the hidden-layer loop and
    # the recurrent sizes must line up (same constraints the PyTorch module relies on).
    assert 0 <= rec_layer_in < n_layers - 1, "rec_layer_in must index a hidden layer"
    assert 0 <= rec_layer_out < n_layers - 1, \
        "rec_layer_out must index a hidden layer, otherwise rec output is never written"
    assert inputsizes[rec_layer_in] == rec_size, \
        "recurrent_vals size must match the input size of layer rec_layer_in"
    assert outputsizes[rec_layer_out] == rec_size, \
        "rec_layer input size must match the output size of layer rec_layer_out"

    P = _round_up(max(inputsizes + outputsizes), LANE)   # shared padded feature width
    assert rec_size + nbactions <= P, \
        "merged output row needs rec_size + nbactions lanes"
    if batch_block is not None:
        assert batch_block % ALIGN == 0

    # The rec-layer dot shares its input (post-relu h of layer rec_layer_out) with the
    # dot of the *next* layer -- fuse them into one 2P-wide dot unless the recurrent
    # input is injected exactly at that next layer (then their inputs differ).
    nxt = rec_layer_out + 1
    fuse_rec = (rec_layer_in != nxt)
    L1 = n_layers if fuse_rec else n_layers + 1      # weight-slab slots (+1 unfused rec)
    num_cores = _num_tensorcores()

    def kernel(x_ref, rec0_ref, w_ref, b_ref, out_ref, state_ref):
        t = pl.program_id(1)

        # First timestep of each batch block: seed the VMEM carry with the caller's
        # recurrent values.
        @pl.when(t == 0)
        def _():
            state_ref[...] = rec0_ref[...]

        rec_in = state_ref[...]                # (tb, P) f32; rec values in lanes [0, rec_size)
        h = None
        rec_out = None
        logits = None

        for i in range(n_layers):
            last = (i == n_layers - 1)
            inp = x_ref[0] if i == 0 else h    # x is already bf16; h is f32
            if (not last) and i == rec_layer_in:
                inp = inp + rec_in             # hactiv += recurrent_vals
            inp_bf = inp.astype(jnp.bfloat16)

            if fuse_rec and i == nxt:
                # One 256-wide MXU dot: [ layer_i | rec_layer ] share the same input.
                z = (jnp.dot(inp_bf, w_ref[i], preferred_element_type=jnp.float32)
                     + b_ref[i])               # (tb, 2P) f32
                y = z[:, :P]
                rec_out = z[:, P:]             # rec values in lanes [0, rec_size)
                state_ref[...] = rec_out       # carry to the next timestep
            else:
                y = (jnp.dot(inp_bf, w_ref[i, :, :P],
                             preferred_element_type=jnp.float32)
                     + b_ref[i, :, :P])

            if last:
                # Final-layer weight columns are pre-shifted in pack_params, so the
                # logits already sit in lanes [rec_size, rec_size + nbactions).
                logits = y
            else:
                h = jnp.maximum(y, 0.0)
                if (not fuse_rec) and i == rec_layer_out:
                    rec_out = (jnp.dot(h.astype(jnp.bfloat16),
                                       w_ref[n_layers, :, :P],
                                       preferred_element_type=jnp.float32)
                               + b_ref[n_layers, :, :P])
                    state_ref[...] = rec_out

        # Merged lane-dense output row: rec values in lanes [0, rec_size), action
        # distribution in lanes [rec_size, rec_size+nbactions), zeros elsewhere.
        if sf:
            lane = jax.lax.broadcasted_iota(jnp.int32, logits.shape, 1)
            band = (lane >= rec_size) & (lane < rec_size + nbactions)
            masked = jnp.where(band, logits, jnp.float32(-jnp.inf))
            m = jnp.max(masked, axis=-1, keepdims=True)
            e = jnp.exp(masked - m)            # exact 0 outside the action band
            acts = e * pl.reciprocal(jnp.sum(e, axis=-1, keepdims=True), approx=True)
        else:
            acts = logits                      # exact 0 outside the action band
        out_ref[0] = acts + rec_out

    def _build_call(T, b_pad, tb):
        nb = b_pad // tb
        return pl.pallas_call(
            kernel,
            out_shape=jax.ShapeDtypeStruct((T, b_pad, P), jnp.float32),
            grid_spec=pltpu.PrefetchScalarGridSpec(
                num_scalar_prefetch=0,
                grid=(nb, T),                  # T innermost: sequential state carry
                in_specs=[
                    pl.BlockSpec((1, tb, P), lambda b, t: (t, b, 0)),      # observations
                    pl.BlockSpec((tb, P), lambda b, t: (b, 0)),            # initial rec state
                    pl.BlockSpec((L1, P, 2 * P), lambda b, t: (0, 0, 0)),  # weights (resident)
                    pl.BlockSpec((L1, 1, 2 * P), lambda b, t: (0, 0, 0)),  # biases  (resident)
                ],
                out_specs=pl.BlockSpec((1, tb, P), lambda b, t: (t, b, 0)),
                scratch_shapes=[pltpu.VMEM((tb, P), jnp.float32)],
            ),
            compiler_params=pltpu.CompilerParams(
                dimension_semantics=("parallel", "arbitrary")),
        )

    @jax.jit
    def rollout(xs, rec0, w_stack, b_stack):
        """xs: (T, B, isize) observations, rec0: (B, rec_size) initial recurrent values.
        Returns act_dis (T, B, nbactions) and rec_layer_values (T, B, rec_size);
        the rec output of step t is the recurrent input of step t+1."""
        T, B = xs.shape[0], xs.shape[1]
        if batch_block is None:
            # One batch block per TensorCore: both v7x TCs get work, no extra grid
            # steps on single-TC v5e/v6e; cap keeps VMEM use tiny even for huge B.
            tb = min(_round_up(pl.cdiv(B, num_cores), ALIGN), MAX_BATCH_BLOCK)
        else:
            tb = batch_block
        b_pad = _round_up(B, tb)
        xs_p = jnp.zeros((T, b_pad, P), jnp.bfloat16)
        xs_p = xs_p.at[:, :B, :isize].set(xs.astype(jnp.bfloat16))
        rec_p = jnp.zeros((b_pad, P), jnp.float32)
        rec_p = rec_p.at[:B, :rec_size].set(rec0.astype(jnp.float32))
        out = _build_call(T, b_pad, tb)(xs_p, rec_p, w_stack, b_stack)
        recs = out[:, :B, :rec_size]
        acts = out[:, :B, rec_size:rec_size + nbactions]
        return acts, recs

    def forward(x, recurrent_vals, w_stack, b_stack):
        """One module forward applied independently to a batch of environments:
        x (B, isize), recurrent_vals (B, rec_size)."""
        acts, recs = rollout(x[None, ...], recurrent_vals, w_stack, b_stack)
        return acts[0], recs[0]

    def pack_params(params):
        """Pack (pre-transposed, (in, out)) weights/biases into the fused VMEM slabs."""
        w_stack = jnp.zeros((L1, P, 2 * P), jnp.float32)
        b_stack = jnp.zeros((L1, 1, 2 * P), jnp.float32)
        for i in range(n_layers):
            w = params[f"w{i}"]
            b = params[f"b{i}"]
            # Final layer's output columns are shifted past the rec lanes so logits
            # land directly in their lanes of the merged output row.
            col = rec_size if i == n_layers - 1 else 0
            w_stack = w_stack.at[i, :w.shape[0], col:col + w.shape[1]].set(w)
            b_stack = b_stack.at[i, 0, col:col + b.shape[0]].set(b)
        wr, br = params["w_rec"], params["b_rec"]
        if fuse_rec:
            w_stack = w_stack.at[nxt, :wr.shape[0], P:P + wr.shape[1]].set(wr)
            b_stack = b_stack.at[nxt, 0, P:P + br.shape[0]].set(br)
        else:
            w_stack = w_stack.at[n_layers, :wr.shape[0], :wr.shape[1]].set(wr)
            b_stack = b_stack.at[n_layers, 0, :br.shape[0]].set(br)
        return w_stack.astype(jnp.bfloat16), b_stack

    return rollout, forward, pack_params, inputsizes, outputsizes, rec_size


def init_params(key, inputsizes, outputsizes, rec_size):
    """Deterministic PyTorch-Linear-style init; weights stored transposed (in, out)."""
    params = {}
    n_layers = len(outputsizes)
    for i in range(n_layers):
        fan_in, fan_out = inputsizes[i], outputsizes[i]
        bound = 1.0 / np.sqrt(fan_in)
        key, k1, k2 = jax.random.split(key, 3)
        params[f"w{i}"] = jax.random.uniform(
            k1, (fan_in, fan_out), jnp.float32, -bound, bound)
        params[f"b{i}"] = jax.random.uniform(
            k2, (fan_out,), jnp.float32, -bound, bound)
    bound = 1.0 / np.sqrt(rec_size)
    key, k1, k2 = jax.random.split(key, 3)
    params["w_rec"] = jax.random.uniform(
        k1, (rec_size, rec_size), jnp.float32, -bound, bound)
    params["b_rec"] = jax.random.uniform(
        k2, (rec_size,), jnp.float32, -bound, bound)
    return params


def _bf16(x):
    return x.astype(jnp.bfloat16)


def reference_step(x, rec, params, n_layers, rec_layer_in, rec_layer_out, sf):
    """Pure-JAX reference mirroring one PyTorch module forward per batch row, using the
    same precision recipe as the kernel (bf16 weights/activations, f32 accumulate)."""
    h = x
    rec_out = None
    for i in range(n_layers - 1):
        if i == rec_layer_in:
            h = h + rec
        h = jnp.maximum(
            jnp.dot(_bf16(h), _bf16(params[f"w{i}"]),
                    preferred_element_type=jnp.float32) + params[f"b{i}"], 0.0)
        if i == rec_layer_out:
            rec_out = (jnp.dot(_bf16(h), _bf16(params["w_rec"]),
                               preferred_element_type=jnp.float32) + params["b_rec"])
    logits = (jnp.dot(_bf16(h), _bf16(params[f"w{n_layers - 1}"]),
                      preferred_element_type=jnp.float32) + params[f"b{n_layers - 1}"])
    act = jax.nn.softmax(logits, axis=-1) if sf else logits   # per-row action softmax
    return act, rec_out


def reference_rollout(xs, rec0, params, n_layers, rec_layer_in, rec_layer_out, sf):
    rec = rec0
    acts, recs = [], []
    for t in range(xs.shape[0]):
        act, rec = reference_step(xs[t], rec, params, n_layers,
                                  rec_layer_in, rec_layer_out, sf)
        acts.append(act)
        recs.append(rec)
    return jnp.stack(acts), jnp.stack(recs)


if __name__ == "__main__":
    # Pole-balance-style configuration.
    ISIZE = 4                # cartpole observation size
    HSIZES = [32, 32]        # hidden layer sizes (equal -> recurrent shapes consistent)
    NBACTIONS = 2
    REC_LAYER_IN = 1
    REC_LAYER_OUT = 1
    SF = True

    B = 128                  # environments per call -> full 128-row MXU matmuls
    T = 8                    # fused recurrent steps per pallas_call (weights stay resident)
    # In online RL the next observation depends on the previous action; the fused T-step
    # rollout is for pre-known observation sequences (stored trajectories / teacher
    # forcing). forward() (T=1) is the online single-step path.

    rollout, forward, pack_params, inputsizes, outputsizes, rec_size = \
        make_recurrent_network(ISIZE, HSIZES, NBACTIONS, REC_LAYER_IN,
                               REC_LAYER_OUT, sf=SF, batch_block=None)

    key = jax.random.PRNGKey(0)
    key, kp, kx, kr = jax.random.split(key, 4)
    params = init_params(kp, inputsizes, outputsizes, rec_size)
    w_stack, b_stack = pack_params(params)

    xs = jax.random.normal(kx, (T, B, ISIZE), jnp.float32)
    rec0 = jax.random.normal(kr, (B, rec_size), jnp.float32)

    n_layers = len(HSIZES) + 1
    # bf16 weights/activations in the kernel and the matched reference; approx
    # reciprocal in the softmax -> tolerances set accordingly.
    RTOL, ATOL = 5e-3, 5e-3

    # 1) Single-step (T=1) forward == one PyTorch module forward per environment row.
    act1, rec1 = forward(xs[0], rec0, w_stack, b_stack)
    jax.block_until_ready((act1, rec1))
    ref_a1, ref_r1 = reference_step(xs[0], rec0, params, n_layers,
                                    REC_LAYER_IN, REC_LAYER_OUT, SF)
    assert act1.shape == (B, NBACTIONS) and rec1.shape == (B, rec_size)
    np.testing.assert_allclose(np.asarray(act1), np.asarray(ref_a1),
                               rtol=RTOL, atol=ATOL)
    np.testing.assert_allclose(np.asarray(rec1), np.asarray(ref_r1),
                               rtol=RTOL, atol=ATOL)

    # 2) Fused T-step rollout: one launch, weights DMA'd once, state carried in VMEM.
    acts, recs = rollout(xs, rec0, w_stack, b_stack)
    jax.block_until_ready((acts, recs))
    ref_acts, ref_recs = reference_rollout(xs, rec0, params, n_layers,
                                           REC_LAYER_IN, REC_LAYER_OUT, SF)
    assert acts.shape == (T, B, NBACTIONS) and recs.shape == (T, B, rec_size)
    np.testing.assert_allclose(np.asarray(acts), np.asarray(ref_acts),
                               rtol=RTOL, atol=ATOL)
    np.testing.assert_allclose(np.asarray(recs), np.asarray(ref_recs),
                               rtol=RTOL, atol=ATOL)

    print("KERNEL_OK")
</pallas_src>

<mosaic_0001>
module attributes {stable_mosaic.version = 11 : i64} {
  func.func @kernel(%arg0: i32, %arg1: i32, %arg2: memref<1x128x128xbf16, #tpu.memory_space<vmem>>, %arg3: memref<128x128xf32, #tpu.memory_space<vmem>>, %arg4: memref<3x128x256xbf16, #tpu.memory_space<vmem>>, %arg5: memref<3x1x256xf32, #tpu.memory_space<vmem>>, %arg6: memref<1x128x128xf32, #tpu.memory_space<vmem>>, %arg7: memref<128x128xf32, #tpu.memory_space<vmem>>) attributes {dimension_semantics = [#tpu.dimension_semantics<parallel>, #tpu.dimension_semantics<arbitrary>], iteration_bounds = array<i64: 1, 1>, scalar_prefetch = 0 : i64, scratch_operands = 1 : i64, tpu.core_type = #tpu.core_type<tc>, window_params = [{transform_indices = @transform_0, window_bounds = array<i64: 1, 128, 128>}, {transform_indices = @transform_1, window_bounds = array<i64: 128, 128>}, {pipeline_mode = #tpu.pipeline_mode<synchronous>, transform_indices = @transform_2, window_bounds = array<i64: 3, 128, 256>}, {pipeline_mode = #tpu.pipeline_mode<synchronous>, transform_indices = @transform_3, window_bounds = array<i64: 3, 1, 256>}, {transform_indices = @transform_4, window_bounds = array<i64: 1, 128, 128>}]} {
    %c0_i32 = arith.constant 0 : i32
    %0 = arith.cmpi eq, %arg1, %c0_i32 : i32
    %1 = arith.extui %0 : i1 to i32
    %c0_i32_0 = arith.constant 0 : i32
    %2 = arith.cmpi ne, %1, %c0_i32_0 : i32
    scf.if %2 {
      %c0_33 = arith.constant 0 : index
      %c0_34 = arith.constant 0 : index
      %59 = vector.load %arg3[%c0_33, %c0_34] : memref<128x128xf32, #tpu.memory_space<vmem>>, vector<128x128xf32>
      %c0_35 = arith.constant 0 : index
      %c0_36 = arith.constant 0 : index
      %60 = vector.load %arg7[%c0_35, %c0_36] : memref<128x128xf32, #tpu.memory_space<vmem>>, vector<128x128xf32>
      tpu.vector_store %arg7[%c0_35, %c0_36], %59 {strides = array<i32>} : memref<128x128xf32, #tpu.memory_space<vmem>>, vector<128x128xf32>,
    } else {
    }
    %c0 = arith.constant 0 : index
    %c0_1 = arith.constant 0 : index
    %3 = vector.load %arg7[%c0, %c0_1] : memref<128x128xf32, #tpu.memory_space<vmem>>, vector<128x128xf32>
    %c0_2 = arith.constant 0 : index
    %c0_3 = arith.constant 0 : index
    %c0_4 = arith.constant 0 : index
    %4 = vector.load %arg2[%c0_2, %c0_3, %c0_4] : memref<1x128x128xbf16, #tpu.memory_space<vmem>>, vector<1x128x128xbf16>
    %5 = vector.shape_cast %4 : vector<1x128x128xbf16> to vector<128x128xbf16>
    %c0_5 = arith.constant 0 : index
    %c0_6 = arith.constant 0 : index
    %c0_7 = arith.constant 0 : index
    %6 = vector.load %arg4[%c0_5, %c0_6, %c0_7] : memref<3x128x256xbf16, #tpu.memory_space<vmem>>, vector<1x128x128xbf16>
    %7 = vector.shape_cast %6 : vector<1x128x128xbf16> to vector<128x128xbf16>
    %cst = arith.constant dense<0.000000e+00> : vector<128x128xf32>
    %8 = tpu.matmul %5, %7, %cst {dimension_numbers = #tpu.dot_dimension_numbers<[1], [0], [0], [1], [0, 0, 1, 1], [], []>} : vector<128x128xbf16>, vector<128x128xbf16>, vector<128x128xf32> -> vector<128x128xf32>
    %c0_8 = arith.constant 0 : index
    %c0_9 = arith.constant 0 : index
    %c0_10 = arith.constant 0 : index
    %9 = vector.load %arg5[%c0_8, %c0_9, %c0_10] : memref<3x1x256xf32, #tpu.memory_space<vmem>>, vector<1x1x128xf32>
    %10 = vector.shape_cast %9 : vector<1x1x128xf32> to vector<1x128xf32>
    %11 = vector.broadcast %10 : vector<1x128xf32> to vector<128x128xf32>
    %12 = arith.addf %8, %11 : vector<128x128xf32>
    %cst_11 = arith.constant 0.000000e+00 : f32
    %13 = vector.broadcast %cst_11 : f32 to vector<128x128xf32>
    %14 = arith.maximumf %12, %13 : vector<128x128xf32>
    %15 = arith.addf %14, %3 : vector<128x128xf32>
    %16 = arith.truncf %15 : vector<128x128xf32> to vector<128x128xbf16>
    %c1 = arith.constant 1 : index
    %c0_12 = arith.constant 0 : index
    %c0_13 = arith.constant 0 : index
    %17 = vector.load %arg4[%c1, %c0_12, %c0_13] : memref<3x128x256xbf16, #tpu.memory_space<vmem>>, vector<1x128x128xbf16>
    %18 = vector.shape_cast %17 : vector<1x128x128xbf16> to vector<128x128xbf16>
    %cst_14 = arith.constant dense<0.000000e+00> : vector<128x128xf32>
    %19 = tpu.matmul %16, %18, %cst_14 {dimension_numbers = #tpu.dot_dimension_numbers<[1], [0], [0], [1], [0, 0, 1, 1], [], []>} : vector<128x128xbf16>, vector<128x128xbf16>, vector<128x128xf32> -> vector<128x128xf32>
    %c1_15 = arith.constant 1 : index
    %c0_16 = arith.constant 0 : index
    %c0_17 = arith.constant 0 : index
    %20 = vector.load %arg5[%c1_15, %c0_16, %c0_17] : memref<3x1x256xf32, #tpu.memory_space<vmem>>, vector<1x1x128xf32>
    %21 = vector.shape_cast %20 : vector<1x1x128xf32> to vector<1x128xf32>
    %22 = vector.broadcast %21 : vector<1x128xf32> to vector<128x128xf32>
    %23 = arith.addf %19, %22 : vector<128x128xf32>
    %cst_18 = arith.constant 0.000000e+00 : f32
    %24 = vector.broadcast %cst_18 : f32 to vector<128x128xf32>
    %25 = arith.maximumf %23, %24 : vector<128x128xf32>
    %26 = arith.truncf %25 : vector<128x128xf32> to vector<128x128xbf16>
    %c2 = arith.constant 2 : index
    %c0_19 = arith.constant 0 : index
    %c0_20 = arith.constant 0 : index
    %27 = vector.load %arg4[%c2, %c0_19, %c0_20] : memref<3x128x256xbf16, #tpu.memory_space<vmem>>, vector<1x128x256xbf16>
    %28 = vector.shape_cast %27 : vector<1x128x256xbf16> to vector<128x256xbf16>
    %cst_21 = arith.constant dense<0.000000e+00> : vector<128x256xf32>
    %29 = tpu.matmul %26, %28, %cst_21 {dimension_numbers = #tpu.dot_dimension_numbers<[1], [0], [0], [1], [0, 0, 1, 1], [], []>} : vector<128x128xbf16>, vector<128x256xbf16>, vector<128x256xf32> -> vector<128x256xf32>
    %c2_22 = arith.constant 2 : index
    %c0_23 = arith.constant 0 : index
    %c0_24 = arith.constant 0 : index
    %30 = vector.load %arg5[%c2_22, %c0_23, %c0_24] : memref<3x1x256xf32, #tpu.memory_space<vmem>>, vector<1x1x256xf32>
    %31 = vector.shape_cast %30 : vector<1x1x256xf32> to vector<1x256xf32>
    %32 = vector.broadcast %31 : vector<1x256xf32> to vector<128x256xf32>
    %33 = arith.addf %29, %32 : vector<128x256xf32>
    %34 = vector.extract_strided_slice %33 {offsets = [0, 0], sizes = [128, 128], strides = [1, 1]} : vector<128x256xf32> to vector<128x128xf32>
    %35 = vector.extract_strided_slice %33 {offsets = [0, 128], sizes = [128, 128], strides = [1, 1]} : vector<128x256xf32> to vector<128x128xf32>
    %c0_25 = arith.constant 0 : index
    %c0_26 = arith.constant 0 : index
    %36 = vector.load %arg7[%c0_25, %c0_26] : memref<128x128xf32, #tpu.memory_space<vmem>>, vector<128x128xf32>
    tpu.vector_store %arg7[%c0_25, %c0_26], %35 {strides = array<i32>} : memref<128x128xf32, #tpu.memory_space<vmem>>, vector<128x128xf32>,
    %37 = tpu.iota {dimensions = array<i32: 1>} : vector<128x128xi32>
    %c32_i32 = arith.constant 32 : i32
    %38 = vector.broadcast %c32_i32 : i32 to vector<128x128xi32>
    %39 = arith.cmpi sge, %37, %38 : vector<128x128xi32>
    %c34_i32 = arith.constant 34 : i32
    %40 = vector.broadcast %c34_i32 : i32 to vector<128x128xi32>
    %41 = arith.cmpi slt, %37, %40 : vector<128x128xi32>
    %42 = arith.andi %39, %41 : vector<128x128xi1>
    %cst_27 = arith.constant 0xFF800000 : f32
    %43 = vector.broadcast %cst_27 : f32 to vector<128x128xf32>
    %44 = arith.select %42, %34, %43 : vector<128x128xi1>, vector<128x128xf32>
    %cst_28 = arith.constant dense<0xFF800000> : vector<128xf32>
    %45 = vector.multi_reduction <maximumf>, %44, %cst_28 [1] : vector<128x128xf32> to vector<128xf32>
    %46 = vector.shape_cast %45 : vector<128xf32> to vector<128x1xf32>
    %47 = vector.broadcast %46 : vector<128x1xf32> to vector<128x128xf32>
    %48 = arith.subf %44, %47 : vector<128x128xf32>
    %49 = math.exp %48 : vector<128x128xf32>
    %cst_29 = arith.constant dense<0.000000e+00> : vector<128xf32>
    %50 = vector.multi_reduction <add>, %49, %cst_29 [1] : vector<128x128xf32> to vector<128xf32>
    %51 = vector.shape_cast %50 : vector<128xf32> to vector<128x1xf32>
    %52 = tpu.reciprocal %51 {approx = true} : vector<128x1xf32> -> vector<128x1xf32>
    %53 = vector.broadcast %52 : vector<128x1xf32> to vector<128x128xf32>
    %54 = arith.mulf %49, %53 : vector<128x128xf32>
    %55 = arith.addf %54, %35 : vector<128x128xf32>
    %c0_30 = arith.constant 0 : index
    %c0_31 = arith.constant 0 : index
    %c0_32 = arith.constant 0 : index
    %56 = vector.load %arg6[%c0_30, %c0_31, %c0_32] : memref<1x128x128xf32, #tpu.memory_space<vmem>>, vector<1x128x128xf32>
    %57 = vector.shape_cast %56 : vector<1x128x128xf32> to vector<128x128xf32>
    %58 = vector.shape_cast %55 : vector<128x128xf32> to vector<1x128x128xf32>
    tpu.vector_store %arg6[%c0_30, %c0_31, %c0_32], %58 {strides = array<i32>} : memref<1x128x128xf32, #tpu.memory_space<vmem>>, vector<1x128x128xf32>,
    return
  }
  func.func @transform_0(%arg0: i32, %arg1: i32) -> (i32, i32, i32) {
    %c0_i32 = arith.constant 0 : i32
    %c0_i32_0 = arith.constant 0 : i32
    return %arg1, %arg0, %c0_i32 : i32, i32, i32
  }
  func.func @transform_1(%arg0: i32, %arg1: i32) -> (i32, i32) {
    %c0_i32 = arith.constant 0 : i32
    %c0_i32_0 = arith.constant 0 : i32
    return %arg0, %c0_i32 : i32, i32
  }
  func.func @transform_2(%arg0: i32, %arg1: i32) -> (i32, i32, i32) {
    %c0_i32 = arith.constant 0 : i32
    %c0_i32_0 = arith.constant 0 : i32
    %c0_i32_1 = arith.constant 0 : i32
    %c0_i32_2 = arith.constant 0 : i32
    return %c0_i32, %c0_i32_0, %c0_i32_1 : i32, i32, i32
  }
  func.func @transform_3(%arg0: i32, %arg1: i32) -> (i32, i32, i32) {
    %c0_i32 = arith.constant 0 : i32
    %c0_i32_0 = arith.constant 0 : i32
    %c0_i32_1 = arith.constant 0 : i32
    %c0_i32_2 = arith.constant 0 : i32
    return %c0_i32, %c0_i32_0, %c0_i32_1 : i32, i32, i32
  }
  func.func @transform_4(%arg0: i32, %arg1: i32) -> (i32, i32, i32) {
    %c0_i32 = arith.constant 0 : i32
    %c0_i32_0 = arith.constant 0 : i32
    return %arg1, %arg0, %c0_i32 : i32, i32, i32
  }
}

</mosaic_0001>

<bundles_post_ra>
// kernel: rollout.1
= control target key start
LH: loop header
LB: loop body
LE: loop exit
PB: predicated region body
PF: predicated region fallthrough
CT: control target
= control target key end

     0   :  { %s1794_s2 = inlined_call_operand.vmem [shape: bf16[3,128,256], index: 2, kind: input, shape index: {}]   ;;  %s1795_s0 = inlined_call_operand.vmem [shape: bf16[1,128,128], index: 0, kind: input, shape index: {}]   ;;  %s1796_s3 = inlined_call_operand.vmem [shape: f32[3,1,256], index: 3, kind: input, shape index: {}]   ;;  %s1797_s1 = inlined_call_operand.vmem [shape: f32[128,128], index: 1, kind: input, shape index: {}]   ;;  %s1798_s4 = inlined_call_operand.vmem [shape: f32[1,128,128], index: 4, kind: output, shape index: {}]  }
   0x1   :  { %v1149_v0 = vld [vmem:[%s1794_s2] ss:$8 sps:$4 sm:$0xff]   ;;  %v1150_v1 = vld [vmem:[%s1794_s2 + $0x10] ss:$8 sps:$4 sm:$0xff]   ;;  %v1173_v24 = vld [vmem:[%s1794_s2 + $0x104] ss:$8 sps:$4 sm:$0xff]  }
   0x2   :  { %1084 = vmatprep.subr.bf16.mxu1 %v1149_v0  ;;  %v1151_v2 = vld [vmem:[%s1794_s2 + $0x20] ss:$8 sps:$4 sm:$0xff]   ;;  %v1152_v3 = vld [vmem:[%s1794_s2 + $0x30] ss:$8 sps:$4 sm:$0xff]   ;;  %v1176_v26 = vld [vmem:[%s1794_s2 + $0x114] ss:$8 sps:$4 sm:$0xff]   ;;  %646 = vmatprep.subr.bf16.mxu0 %v1173_v24 }
   0x3   :  { %1085 = vmatpush3.bf16.msra.mxu1 %v1149_v0  ;;  %v1157_v4 = vld [vmem:[%s1795_s0] sm:$0xff]   ;;  %v1154_v6 = vld [vmem:[%s1794_s2 + $0x50] ss:$8 sps:$4 sm:$0xff]   ;;  %v1158_v10 = vld [vmem:[%s1795_s0 + $0x8] sm:$0xff]  }
   0x4   :  { %1086 = vmatprep.subr.bf16.mxu1 %v1150_v1  ;;  %1100 = vmatprep.mubr.bf16.mxu1 %v1157_v4  ;;  %v1153_v5 = vld [vmem:[%s1794_s2 + $0x40] ss:$8 sps:$4 sm:$0xff]   ;;  %v1156_v8 = vld [vmem:[%s1794_s2 + $0x70] ss:$8 sps:$4 sm:$0xff]   ;;  %v1179_v28 = vld [vmem:[%s1794_s2 + $0x124] ss:$8 sps:$4 sm:$0xff]  }
   0x5   :  { %v1155_v7 = vld [vmem:[%s1794_s2 + $0x60] ss:$8 sps:$4 sm:$0xff]   ;;  %v1159_v11 = vld [vmem:[%s1795_s0 + $0x10] sm:$0xff]   ;;  %v1160_v14 = vld [vmem:[%s1795_s0 + $0x18] sm:$0xff]  }
   0x6   :  { %v1165_v9 = vld [vmem:[%s1794_s2 + $0x80] ss:$8 sps:$4 sm:$0xff]   ;;  %v1166_v12 = vld [vmem:[%s1794_s2 + $0x90] ss:$8 sps:$4 sm:$0xff]   ;;  %v1182_v30 = vld [vmem:[%s1794_s2 + $0x134] ss:$8 sps:$4 sm:$0xff]  }
   0x7   :  { %1087 = vmatpush3.bf16.msra.mxu1 %v1150_v1  ;;  %v1167_v13 = vld [vmem:[%s1794_s2 + $0xa0] ss:$8 sps:$4 sm:$0xff]   ;;  %v1168_v16 = vld [vmem:[%s1794_s2 + $0xb0] ss:$8 sps:$4 sm:$0xff]   ;;  %v1185_v32 = vld [vmem:[%s1794_s2 + $0x144] ss:$8 sps:$4 sm:$0xff]  }
   0x8   :  { %1088 = vmatprep.subr.bf16.mxu1 %v1151_v2  ;;  %v1161_v15 = vld [vmem:[%s1795_s0 + $0x20] sm:$0xff]   ;;  %v1162_v18 = vld [vmem:[%s1795_s0 + $0x28] sm:$0xff]   ;;  %v1163_v19 = vld [vmem:[%s1795_s0 + $0x30] sm:$0xff]  }
   0x9   :  { %v1169_v17 = vld [vmem:[%s1794_s2 + $0xc0] ss:$8 sps:$4 sm:$0xff]   ;;  %v1164_v20 = vld [vmem:[%s1795_s0 + $0x38] sm:$0xff]   ;;  %v24_v45 = vld [vmem:[%s1797_s1 + $0x10] sm:$0xff] }
   0xa   :  { %v1170_v21 = vld [vmem:[%s1794_s2 + $0xd0] ss:$8 sps:$4 sm:$0xff]   ;;  %v1171_v22 = vld [vmem:[%s1794_s2 + $0xe0] ss:$8 sps:$4 sm:$0xff]   ;;  %v1188_v34 = vld [vmem:[%s1794_s2 + $0x154] ss:$8 sps:$4 sm:$0xff]  }
   0xb   :  { %1089 = vmatpush3.bf16.msra.mxu1 %v1151_v2  ;;  %v1172_v23 = vld [vmem:[%s1794_s2 + $0xf0] ss:$8 sps:$4 sm:$0xff]   ;;  %v1175_v25 = vld [vmem:[%s1794_s2 + $0x100] ss:$8 sps:$4 sm:$0xff]  }
   0xc   :  { %1090 = vmatprep.subr.bf16.mxu1 %v1152_v3  ;;  %647 = vmatpush1.bf16.msra.mxu0 %v1175_v25  ;;  %v1178_v27 = vld [vmem:[%s1794_s2 + $0x110] ss:$8 sps:$4 sm:$0xff]   ;;  %v1181_v29 = vld [vmem:[%s1794_s2 + $0x120] ss:$8 sps:$4 sm:$0xff]  }
   0xd   :  { %648 = vmatprep.subr.bf16.mxu0 %v1176_v26  ;;  %v1184_v31 = vld [vmem:[%s1794_s2 + $0x130] ss:$8 sps:$4 sm:$0xff]   ;;  %v1187_v33 = vld [vmem:[%s1794_s2 + $0x140] ss:$8 sps:$4 sm:$0xff]  }
   0xe   :  { %v1190_v35 = vld [vmem:[%s1794_s2 + $0x150] ss:$8 sps:$4 sm:$0xff]   ;;  %v1398_v36 = vld [vmem:[%s1796_s3] ss:$0 sm:$0xff]  ;;  %v23_v51 = vld [vmem:[%s1797_s1 + $0x8] sm:$0xff] }
   0xf   :  { %1091 = vmatpush3.bf16.msra.mxu1 %v1152_v3  ;;  %v25_v47 = vld [vmem:[%s1797_s1 + $0x18] sm:$0xff]  ;;  %v22_v49 = vld [vmem:[%s1797_s1] sm:$0xff]  ;;  %v28_v61 = vld [vmem:[%s1797_s1 + $0x30] sm:$0xff] }
  0x10   :  { %1092 = vmatprep.subr.bf16.mxu1 %v1153_v5  ;;  %649 = vmatpush1.bf16.msra.mxu0 %v1178_v27  ;;  %v26_v2 = vld [vmem:[%s1797_s1 + $0x20] sm:$0xff] }
  0x11   :  { %650 = vmatprep.subr.bf16.mxu0 %v1179_v28  ;;  %v30_v24 = vld [vmem:[%s1797_s1 + $0x40] sm:$0xff]  ;;  %v33_v28 = vld [vmem:[%s1797_s1 + $0x58] sm:$0xff] }
  0x13   :  { %1093 = vmatpush3.bf16.msra.mxu1 %v1153_v5 }
  0x14   :  { %1094 = vmatprep.subr.bf16.mxu1 %v1154_v6  ;;  %651 = vmatpush1.bf16.msra.mxu0 %v1181_v29 }
  0x15   :  { %652 = vmatprep.subr.bf16.mxu0 %v1182_v30 }
  0x17   :  { %1095 = vmatpush3.bf16.msra.mxu1 %v1154_v6  ;;  %v29_v6 = vld [vmem:[%s1797_s1 + $0x38] sm:$0xff] }
  0x18   :  { %1096 = vmatprep.subr.bf16.mxu1 %v1155_v7  ;;  %653 = vmatpush1.bf16.msra.mxu0 %v1184_v31 }
  0x19   :  { %654 = vmatprep.subr.bf16.mxu0 %v1185_v32  ;;  %v31_v32 = vld [vmem:[%s1797_s1 + $0x48] sm:$0xff] }
  0x1b   :  { %1097 = vmatpush3.bf16.msra.mxu1 %v1155_v7 }
  0x1c   :  { %1098 = vmatprep.subr.bf16.mxu1 %v1156_v8  ;;  %655 = vmatpush1.bf16.msra.mxu0 %v1187_v33 }
  0x1d   :  { %656 = vmatprep.subr.bf16.mxu0 %v1188_v34 }
  0x1f   :  { %1099 = vmatpush3.bf16.msra.mxu1 %v1156_v8 }
  0x20   :  { %1116 = vmatprep.subr.bf16.mxu1 %v1165_v9  ;;  %657 = vmatpush1.bf16.msra.mxu0 %v1190_v35 }
  0x22   :  { %1101 = vmatmul.mubr.bf16.vlgmr.msra.gmra.mrb[0].mxu1 %v1158_v10  ;;  %v27_v10 = vld [vmem:[%s1797_s1 + $0x28] sm:$0xff] }
  0x23   :  { %1104 = vmatprep.mubr.bf16.mxu1 %v1159_v11  ;;  %1117 = vmatpush3.bf16.msra.mxu1 %v1165_v9 }
  0x24   :  { %1118 = vmatprep.subr.bf16.mxu1 %v1166_v12 }
  0x27   :  { %1119 = vmatpush3.bf16.msra.mxu1 %v1166_v12 }
  0x28   :  { %1120 = vmatprep.subr.bf16.mxu1 %v1167_v13 }
  0x2a   :  { %1105 = vmatmul.mubr.bf16.gmra.mrb[4].mxu1 %v1160_v14 }
  0x2b   :  { %1108 = vmatprep.mubr.bf16.mxu1 %v1161_v15  ;;  %1121 = vmatpush3.bf16.msra.mxu1 %v1167_v13 }
  0x2c   :  { %1122 = vmatprep.subr.bf16.mxu1 %v1168_v16 }
  0x2f   :  { %1123 = vmatpush3.bf16.msra.mxu1 %v1168_v16 }
  0x30   :  { %1124 = vmatprep.subr.bf16.mxu1 %v1169_v17 }
  0x32   :  { %1109 = vmatmul.mubr.bf16.gmra.mrb[8].mxu1 %v1162_v18 }
  0x33   :  { %1112 = vmatprep.mubr.bf16.mxu1 %v1163_v19  ;;  %1125 = vmatpush3.bf16.msra.mxu1 %v1169_v17 }
  0x34   :  { %1126 = vmatprep.subr.bf16.mxu1 %v1170_v21 }
  0x37   :  { %1127 = vmatpush3.bf16.msra.mxu1 %v1170_v21 }
  0x38   :  { %1128 = vmatprep.subr.bf16.mxu1 %v1171_v22 }
  0x3a   :  { %1113 = vmatmul.mubr.bf16.gmra.mrb[12].mxu1 %v1164_v20  ;;  %v32_v20 = vld [vmem:[%s1797_s1 + $0x50] sm:$0xff] }
  0x3b   :  { %1129 = vmatpush3.bf16.msra.mxu1 %v1171_v22 }
  0x3c   :  { %1130 = vmatprep.subr.bf16.mxu1 %v1172_v23 }
  0x3f   :  { %1131 = vmatpush3.bf16.msra.mxu1 %v1172_v23 }
  0xf5   :  { %v1102_v37 = vpop.f32.mrb[0].mxu1 }
  0xf6   :  { %v248_v38 = vadd.f32 %v1102_v37, %v1398_v36  ;;  %v239_v39 = vpop.f32.mrb[1].mxu1 }
  0xf7   :  { %v240_v40 = vadd.f32 %v1398_v36, %v239_v39  ;;  %v1103_v41 = vpop.f32.mrb[2].mxu1 }
  0xf8   :  { %v304_v42 = vmax.f32 %v248_v38, 0.0  ;;  %v251_v43 = vadd.f32 %v1103_v41, %v1398_v36  ;;  %v242_v44 = vpop.f32.mrb[3].mxu1 }
  0xf9   :  { %v302_v46 = vmax.f32 %v240_v40, 0.0  ;;  %v243_v48 = vadd.f32 %v1398_v36, %v242_v44 }
  0xfa   :  { %v305_v50 = vmax.f32 %v251_v43, 0.0  ;;  %v320_v53 = vadd.f32 %v304_v42, %v24_v45  ;;  %v36_v43 = vld [vmem:[%s1797_s1 + $0x70] sm:$0xff] }
  0xfb   :  { %v303_v52 = vmax.f32 %v243_v48, 0.0  ;;  %v318_v55 = vadd.f32 %v302_v46, %v22_v49 }
  0xfc   :  { %v321_v54 = vadd.f32 %v305_v50, %v25_v47  ;;  %v34_v47 = vld [vmem:[%s1797_s1 + $0x60] sm:$0xff] }
  0xfd   :  { %v319_v56 = vadd.f32 %v303_v52, %v23_v51  ;;  %v1106_v57 = vpop.f32.mrb[4].mxu1  ;;  %v37_v51 = vld [vmem:[%s1797_s1 + $0x78] sm:$0xff] }
  0xfe   :  { %v335_v58 = vpack.c.bf16 %v321_v54, %v320_v53  ;;  %v264_v59 = vadd.f32 %v1106_v57, %v1398_v36  ;;  %v255_v60 = vpop.f32.mrb[5].mxu1 }
  0xff   :  { %v256_v62 = vadd.f32 %v1398_v36, %v255_v60  ;;  %v1107_v63 = vpop.f32.mrb[6].mxu1  ;;  %v334_v0 = vpack.c.bf16 %v319_v56, %v318_v55  ;;  %v35_v55 = vld [vmem:[%s1797_s1 + $0x68] sm:$0xff] }
 0x100   :  { %v308_v1 = vmax.f32 %v264_v59, 0.0  ;;  %v267_v3 = vadd.f32 %v1107_v63, %v1398_v36  ;;  %v258_v4 = vpop.f32.mrb[7].mxu1  ;;  %v1194_v63 = vld [vmem:[%s1794_s2 + $0x174] ss:$8 sps:$4 sm:$0xff]  }
 0x101   :  { %v306_v5 = vmax.f32 %v256_v62, 0.0  ;;  %v259_v7 = vadd.f32 %v1398_v36, %v258_v4  ;;  %1132 = vmatprep.mubr.bf16.mxu1 %v334_v0  ;;  %v1191_v62 = vld [vmem:[%s1794_s2 + $0x164] ss:$8 sps:$4 sm:$0xff]   ;;  %v1196_v0 = vld [vmem:[%s1794_s2 + $0x170] ss:$8 sps:$4 sm:$0xff]  }
 0x102   :  { %v324_v8 = vadd.f32 %v308_v1, %v28_v61  ;;  %v309_v9 = vmax.f32 %v267_v3, 0.0  ;;  %1133 = vmatmul.mubr.bf16.vlgmr.msra.gmra.mrb[16].mxu1 %v335_v58  ;;  %658 = vmatprep.subr.bf16.mxu0 %v1191_v62  ;;  %v1261_v1 = vmov 0  }
 0x103   :  { %v322_v11 = vadd.f32 %v306_v5, %v26_v2  ;;  %v307_v12 = vmax.f32 %v259_v7, 0.0  ;;  %678 = vmatprep.mubr.bf16.mxu0 %v1261_v1  ;;  %v1010_v2 = vld [vmem:[%s1796_s3 + $0x2] ss:$0 sm:$0xff] }
 0x104   :  { %v325_v13 = vadd.f32 %v309_v9, %v29_v6 }
 0x105   :  { %v323_v14 = vadd.f32 %v307_v12, %v27_v10  ;;  %v1110_v15 = vpop.f32.mrb[8].mxu1 }
 0x106   :  { %v337_v16 = vpack.c.bf16 %v325_v13, %v324_v8  ;;  %v280_v17 = vadd.f32 %v1110_v15, %v1398_v36  ;;  %v271_v18 = vpop.f32.mrb[9].mxu1 }
 0x107   :  { %v336_v19 = vpack.c.bf16 %v323_v14, %v322_v11  ;;  %v272_v21 = vadd.f32 %v1398_v36, %v271_v18  ;;  %v1111_v22 = vpop.f32.mrb[10].mxu1 }
 0x108   :  { %v312_v23 = vmax.f32 %v280_v17, 0.0  ;;  %v283_v25 = vadd.f32 %v1111_v22, %v1398_v36  ;;  %v274_v26 = vpop.f32.mrb[11].mxu1 }
 0x109   :  { %1136 = vmatprep.mubr.bf16.mxu1 %v336_v19  ;;  %v310_v27 = vmax.f32 %v272_v21, 0.0  ;;  %v275_v29 = vadd.f32 %v1398_v36, %v274_v26 }
 0x10a   :  { %1137 = vmatmul.mubr.bf16.gmra.mrb[20].mxu1 %v337_v16  ;;  %v328_v30 = vadd.f32 %v312_v23, %v32_v20  ;;  %v313_v31 = vmax.f32 %v283_v25, 0.0 }
 0x10b   :  { %v326_v33 = vadd.f32 %v310_v27, %v30_v24  ;;  %v311_v34 = vmax.f32 %v275_v29, 0.0 }
 0x10c   :  { %v329_v35 = vadd.f32 %v313_v31, %v33_v28 }
 0x10d   :  { %v327_v37 = vadd.f32 %v311_v34, %v31_v32  ;;  %v1114_v38 = vpop.f32.mrb[12].mxu1 }
 0x10e   :  { %v339_v39 = vpack.c.bf16 %v329_v35, %v328_v30  ;;  %v296_v40 = vadd.f32 %v1114_v38, %v1398_v36  ;;  %v287_v41 = vpop.f32.mrb[13].mxu1 }
 0x10f   :  { %v338_v42 = vpack.c.bf16 %v327_v37, %v326_v33  ;;  %v288_v44 = vadd.f32 %v1398_v36, %v287_v41  ;;  %v1115_v45 = vpop.f32.mrb[14].mxu1 }
 0x110   :  { %v316_v46 = vmax.f32 %v296_v40, 0.0  ;;  %v299_v48 = vadd.f32 %v1115_v45, %v1398_v36  ;;  %v290_v49 = vpop.f32.mrb[15].mxu1 }
 0x111   :  { %1140 = vmatprep.mubr.bf16.mxu1 %v338_v42  ;;  %v314_v50 = vmax.f32 %v288_v44, 0.0  ;;  %v291_v52 = vadd.f32 %v1398_v36, %v290_v49  ;;  %v1193_v36 = vld [vmem:[%s1794_s2 + $0x160] ss:$8 sps:$4 sm:$0xff]  }
 0x112   :  { %1141 = vmatmul.mubr.bf16.gmra.mrb[24].mxu1 %v339_v39  ;;  %v332_v53 = vadd.f32 %v316_v46, %v36_v43  ;;  %v317_v54 = vmax.f32 %v299_v48, 0.0  ;;  %659 = vmatpush1.bf16.msra.mxu0 %v1193_v36 }
 0x113   :  { %v330_v56 = vadd.f32 %v314_v50, %v34_v47  ;;  %v315_v57 = vmax.f32 %v291_v52, 0.0  ;;  %660 = vmatprep.subr.bf16.mxu0 %v1194_v63  ;;  %v1493_v63 = vld [vmem:[%s1796_s3 + $0x4] sm:$0x3] }
 0x114   :  { %v333_v58 = vadd.f32 %v317_v54, %v37_v51 }
 0x115   :  { %v331_v59 = vadd.f32 %v315_v57, %v35_v55 }
 0x116   :  { %v341_v60 = vpack.c.bf16 %v333_v58, %v332_v53  ;;  %661 = vmatpush1.bf16.msra.mxu0 %v1196_v0 }
 0x117   :  { %v340_v61 = vpack.c.bf16 %v331_v59, %v330_v56 }
 0x119   :  { %1144 = vmatprep.mubr.bf16.mxu1 %v340_v61 }
 0x11a   :  { %1145 = vmatmul.mubr.bf16.gmra.mrb[28].mxu1 %v341_v60  ;;  %v556_v60 = vlaneseq }
 0x11c   :  { %v1487_v61 = vshrl.u32 %v556_v60, 7  ;;  %v776_v36 = vand.u32 127, %v556_v60 }
 0x11e   :  { %v558_v62 = vsub.s32 0, %v1487_v61  ;;  %vm777_vm0 = vcmp.ge.s32.totalorder %v776_v36, 32  ;;  %vm778_vm1 = vcmp.lt.s32.totalorder %v776_v36, 34 }
 0x11f   :  { %vm1498_vm2 = vmand %vm777_vm0, %vm778_vm1 }
 0x120   :  { %v1496_v0 = vrot.slane %v1493_v63, %v558_v62 }
 0x1d5   :  { %v1134_v3 = vpop.f32.mrb[16].mxu1 }
 0x1d6   :  { %v458_v4 = vadd.f32 %v1134_v3, %v1010_v2  ;;  %v449_v5 = vpop.f32.mrb[17].mxu1 }
 0x1d7   :  { %v450_v6 = vadd.f32 %v1010_v2, %v449_v5  ;;  %v1135_v7 = vpop.f32.mrb[18].mxu1 }
 0x1d8   :  { %v461_v8 = vadd.f32 %v1135_v7, %v1010_v2  ;;  %v452_v9 = vpop.f32.mrb[19].mxu1  ;;  %v514_v11 = vmax.f32 %v458_v4, 0.0 }
 0x1d9   :  { %v453_v10 = vadd.f32 %v1010_v2, %v452_v9  ;;  %v512_v13 = vmax.f32 %v450_v6, 0.0 }
 0x1da   :  { %v515_v12 = vmax.f32 %v461_v8, 0.0 }
 0x1db   :  { %v513_v14 = vmax.f32 %v453_v10, 0.0 }
 0x1dc   :  { %v529_v15 = vpack.c.bf16 %v515_v12, %v514_v11 }
 0x1dd   :  { %v528_v16 = vpack.c.bf16 %v513_v14, %v512_v13  ;;  %v1138_v17 = vpop.f32.mrb[20].mxu1 }
 0x1de   :  { %v474_v18 = vadd.f32 %v1138_v17, %v1010_v2  ;;  %v465_v19 = vpop.f32.mrb[21].mxu1 }
 0x1df   :  { %v466_v20 = vadd.f32 %v1010_v2, %v465_v19  ;;  %679 = vmatmul.mubr.bf16.vlgmr.msra.gmra.mrb[0].mxu0 %v528_v16  ;;  %v1139_v21 = vpop.f32.mrb[22].mxu1 }
 0x1e0   :  { %v518_v22 = vmax.f32 %v474_v18, 0.0  ;;  %v477_v23 = vadd.f32 %v1139_v21, %v1010_v2  ;;  %v468_v24 = vpop.f32.mrb[23].mxu1  ;;  %688 = vmatprep.mubr.bf16.mxu0 %v1261_v1 }
 0x1e1   :  { %v516_v25 = vmax.f32 %v466_v20, 0.0  ;;  %v469_v26 = vadd.f32 %v1010_v2, %v468_v24 }
 0x1e2   :  { %v519_v27 = vmax.f32 %v477_v23, 0.0 }
 0x1e3   :  { %v517_v28 = vmax.f32 %v469_v26, 0.0 }
 0x1e4   :  { %v531_v29 = vpack.c.bf16 %v519_v27, %v518_v22 }
 0x1e5   :  { %v530_v30 = vpack.c.bf16 %v517_v28, %v516_v25  ;;  %v1142_v31 = vpop.f32.mrb[24].mxu1 }
 0x1e6   :  { %v490_v32 = vadd.f32 %v1142_v31, %v1010_v2  ;;  %v481_v33 = vpop.f32.mrb[25].mxu1 }
 0x1e7   :  { %689 = vmatmul.mubr.bf16.gmra.mrb[4].mxu0 %v529_v15  ;;  %v482_v34 = vadd.f32 %v1010_v2, %v481_v33  ;;  %v1143_v35 = vpop.f32.mrb[26].mxu1 }
 0x1e8   :  { %v522_v37 = vmax.f32 %v490_v32, 0.0  ;;  %698 = vmatprep.mubr.bf16.mxu0 %v1261_v1  ;;  %v493_v38 = vadd.f32 %v1143_v35, %v1010_v2  ;;  %v484_v39 = vpop.f32.mrb[27].mxu1 }
 0x1e9   :  { %v520_v40 = vmax.f32 %v482_v34, 0.0  ;;  %v485_v41 = vadd.f32 %v1010_v2, %v484_v39 }
 0x1ea   :  { %v523_v42 = vmax.f32 %v493_v38, 0.0 }
 0x1eb   :  { %v521_v43 = vmax.f32 %v485_v41, 0.0 }
 0x1ec   :  { %v533_v44 = vpack.c.bf16 %v523_v42, %v522_v37 }
 0x1ed   :  { %v532_v45 = vpack.c.bf16 %v521_v43, %v520_v40  ;;  %v1146_v46 = vpop.f32.mrb[28].mxu1 }
 0x1ee   :  { %v506_v47 = vadd.f32 %v1146_v46, %v1010_v2  ;;  %v497_v48 = vpop.f32.mrb[29].mxu1 }
 0x1ef   :  { %699 = vmatmul.mubr.bf16.gmra.mrb[8].mxu0 %v530_v30  ;;  %v498_v49 = vadd.f32 %v1010_v2, %v497_v48  ;;  %v1147_v50 = vpop.f32.mrb[30].mxu1 }
 0x1f0   :  { %708 = vmatprep.mubr.bf16.mxu0 %v1261_v1  ;;  %v526_v51 = vmax.f32 %v506_v47, 0.0  ;;  %v509_v52 = vadd.f32 %v1147_v50, %v1010_v2  ;;  %v500_v53 = vpop.f32.mrb[31].mxu1 }
 0x1f1   :  { %v524_v54 = vmax.f32 %v498_v49, 0.0  ;;  %v501_v55 = vadd.f32 %v1010_v2, %v500_v53 }
 0x1f2   :  { %v527_v56 = vmax.f32 %v509_v52, 0.0 }
 0x1f3   :  { %v525_v57 = vmax.f32 %v501_v55, 0.0 }
 0x1f4   :  { %v535_v58 = vpack.c.bf16 %v527_v56, %v526_v51 }
 0x1f5   :  { %v534_v59 = vpack.c.bf16 %v525_v57, %v524_v54 }
 0x1f7   :  { %709 = vmatmul.mubr.bf16.gmra.mrb[12].mxu0 %v531_v29 }
 0x1f8   :  { %718 = vmatprep.mubr.bf16.mxu0 %v1261_v1 }
 0x1ff   :  { %719 = vmatmul.mubr.bf16.gmra.mrb[16].mxu0 %v532_v45 }
 0x200   :  { %728 = vmatprep.mubr.bf16.mxu0 %v1261_v1 }
 0x207   :  { %729 = vmatmul.mubr.bf16.gmra.mrb[20].mxu0 %v533_v44 }
 0x208   :  { %738 = vmatprep.mubr.bf16.mxu0 %v1261_v1 }
 0x20f   :  { %739 = vmatmul.mubr.bf16.gmra.mrb[24].mxu0 %v534_v59 }
 0x210   :  { %748 = vmatprep.mubr.bf16.mxu0 %v1261_v1 }
 0x217   :  { %749 = vmatmul.mubr.bf16.gmra.mrb[28].mxu0 %v535_v58 }
 0x2b2   :  { %v680_v2 = vpop.f32.mrb[0].mxu0 }
 0x2b3   :  { %v681_v3 = vadd.f32 %v680_v2, %v1496_v0  ;;  %v1503_v4 = vpop.f32.mrb[1].mxu0 }
 0x2b4   :  { %v684_v5 = vpop.f32.mrb[2].mxu0 }
 0x2b5   :  { %v685_v6 = vadd.f32 %v684_v5, %v1496_v0  ;;  %v1506_v7 = vpop.f32.mrb[3].mxu0  ;;  %v1510_v8 = vsel %vm1498_vm2, %v681_v3, -inf }
 0x2b6   :  { %796 = vmax.xlane.f32.xlu0 %v1510_v8 }
 0x2b7   :  { %v1515_v9 = vsel %vm1498_vm2, %v685_v6, -inf }
 0x2ba   :  { %v690_v10 = vpop.f32.mrb[4].mxu0  ;;  %798 = vmax.xlane.f32.xlu0 %v1515_v9 }
 0x2bb   :  { %v691_v11 = vadd.f32 %v690_v10, %v1496_v0  ;;  %v1519_v12 = vpop.f32.mrb[5].mxu0 }
 0x2bc   :  { %v694_v13 = vpop.f32.mrb[6].mxu0 }
 0x2bd   :  { %v695_v14 = vadd.f32 %v694_v13, %v1496_v0  ;;  %v1522_v15 = vpop.f32.mrb[7].mxu0  ;;  %v1526_v16 = vsel %vm1498_vm2, %v691_v11, -inf }
 0x2be   :  { %800 = vmax.xlane.f32.xlu1 %v1526_v16 }
 0x2bf   :  { %v1531_v17 = vsel %vm1498_vm2, %v695_v14, -inf }
 0x2c2   :  { %v700_v18 = vpop.f32.mrb[8].mxu0  ;;  %802 = vmax.xlane.f32.xlu1 %v1531_v17 }
 0x2c3   :  { %v701_v19 = vadd.f32 %v700_v18, %v1496_v0  ;;  %v1535_v20 = vpop.f32.mrb[9].mxu0 }
 0x2c4   :  { %v704_v21 = vpop.f32.mrb[10].mxu0 }
 0x2c5   :  { %v705_v22 = vadd.f32 %v704_v21, %v1496_v0  ;;  %v1538_v23 = vpop.f32.mrb[11].mxu0  ;;  %v1542_v24 = vsel %vm1498_vm2, %v701_v19, -inf }
 0x2c6   :  { %804 = vmax.xlane.f32.xlu0 %v1542_v24 }
 0x2c7   :  { %v1547_v25 = vsel %vm1498_vm2, %v705_v22, -inf }
 0x2c8   :  { %806 = vmax.xlane.f32.xlu1 %v1547_v25 }
 0x2ca   :  { %v710_v26 = vpop.f32.mrb[12].mxu0 }
 0x2cb   :  { %v711_v27 = vadd.f32 %v710_v26, %v1496_v0  ;;  %v1551_v28 = vpop.f32.mrb[13].mxu0 }
 0x2cc   :  { %v714_v29 = vpop.f32.mrb[14].mxu0 }
 0x2cd   :  { %v715_v30 = vadd.f32 %v714_v29, %v1496_v0  ;;  %v1554_v31 = vpop.f32.mrb[15].mxu0  ;;  %v1558_v32 = vsel %vm1498_vm2, %v711_v27, -inf }
 0x2ce   :  { %808 = vmax.xlane.f32.xlu0 %v1558_v32 }
 0x2cf   :  { %v1563_v33 = vsel %vm1498_vm2, %v715_v30, -inf }
 0x2d0   :  { %810 = vmax.xlane.f32.xlu1 %v1563_v33 }
 0x2d2   :  { %v720_v34 = vpop.f32.mrb[16].mxu0 }
 0x2d3   :  { %v721_v35 = vadd.f32 %v720_v34, %v1496_v0  ;;  %v1567_v37 = vpop.f32.mrb[17].mxu0 }
 0x2d4   :  { %v724_v38 = vpop.f32.mrb[18].mxu0 }
 0x2d5   :  { %v725_v39 = vadd.f32 %v724_v38, %v1496_v0  ;;  %v1570_v40 = vpop.f32.mrb[19].mxu0  ;;  %v1574_v41 = vsel %vm1498_vm2, %v721_v35, -inf }
 0x2d6   :  { %812 = vmax.xlane.f32.xlu0 %v1574_v41 }
 0x2d7   :  { %v1579_v42 = vsel %vm1498_vm2, %v725_v39, -inf }
 0x2d8   :  { %814 = vmax.xlane.f32.xlu1 %v1579_v42 }
 0x2da   :  { %v730_v43 = vpop.f32.mrb[20].mxu0 }
 0x2db   :  { %v731_v44 = vadd.f32 %v730_v43, %v1496_v0  ;;  %v1583_v45 = vpop.f32.mrb[21].mxu0 }
 0x2dc   :  { %v734_v46 = vpop.f32.mrb[22].mxu0 }
 0x2dd   :  { %v735_v47 = vadd.f32 %v734_v46, %v1496_v0  ;;  %v1586_v48 = vpop.f32.mrb[23].mxu0  ;;  %v1590_v49 = vsel %vm1498_vm2, %v731_v44, -inf }
 0x2de   :  { %816 = vmax.xlane.f32.xlu0 %v1590_v49 }
 0x2df   :  { %v1595_v50 = vsel %vm1498_vm2, %v735_v47, -inf }
 0x2e0   :  { %818 = vmax.xlane.f32.xlu1 %v1595_v50 }
 0x2e2   :  { %v740_v51 = vpop.f32.mrb[24].mxu0 }
 0x2e3   :  { %v741_v52 = vadd.f32 %v740_v51, %v1496_v0  ;;  %v1599_v53 = vpop.f32.mrb[25].mxu0 }
 0x2e4   :  { %v744_v54 = vpop.f32.mrb[26].mxu0 }
 0x2e5   :  { %v745_v55 = vadd.f32 %v744_v54, %v1496_v0  ;;  %v1602_v56 = vpop.f32.mrb[27].mxu0  ;;  %v1606_v57 = vsel %vm1498_vm2, %v741_v52, -inf }
 0x2e6   :  { %820 = vmax.xlane.f32.xlu0 %v1606_v57 }
 0x2e7   :  { %v1611_v58 = vsel %vm1498_vm2, %v745_v55, -inf }
 0x2e8   :  { %822 = vmax.xlane.f32.xlu1 %v1611_v58 }
 0x2ea   :  { %v750_v59 = vpop.f32.mrb[28].mxu0 }
 0x2eb   :  { %v751_v60 = vadd.f32 %v750_v59, %v1496_v0  ;;  %v1615_v62 = vpop.f32.mrb[29].mxu0 }
 0x2ec   :  { %v754_v36 = vpop.f32.mrb[30].mxu0 }
 0x2ed   :  { %v755_v2 = vadd.f32 %v754_v36, %v1496_v0  ;;  %v1618_v3 = vpop.f32.mrb[31].mxu0  ;;  %v1622_v5 = vsel %vm1498_vm2, %v751_v60, -inf }
 0x2ee   :  { %824 = vmax.xlane.f32.xlu0 %v1622_v5 }
 0x2ef   :  { %v1627_v6 = vsel %vm1498_vm2, %v755_v2, -inf }
 0x2f0   :  { %826 = vmax.xlane.f32.xlu1 %v1627_v6 }
 0x343   :  { %v797_v10 = vpop.xlane.xlu0 %796 }
 0x344   :  { %v828_v11 = vsub.f32 %v1510_v8, %v797_v10 }
 0x346   :  { %v844_v13 = vmul.f32 1.442695, %v828_v11 }
 0x347   :  { %v799_v14 = vpop.xlane.xlu0 %798 }
 0x348   :  { %1197 = vpow2.f32 %v844_v13  ;;  %v829_v0 = vsub.f32 %v1515_v9, %v799_v14 }
 0x34a   :  { %v846_v18 = vmul.f32 1.442695, %v829_v0 }
 0x34b   :  { %v801_v19 = vpop.xlane.xlu1 %800 }
 0x34c   :  { %1199 = vpow2.f32 %v846_v18  ;;  %v830_v21 = vsub.f32 %v1526_v16, %v801_v19 }
 0x34e   :  { %v848_v22 = vmul.f32 1.442695, %v830_v21 }
 0x34f   :  { %v803_v26 = vpop.xlane.xlu1 %802 }
 0x350   :  { %1201 = vpow2.f32 %v848_v22  ;;  %v831_v1 = vsub.f32 %v1531_v17, %v803_v26 }
 0x352   :  { %v1634_v27 = vpop.eup %1197  ;;  %v850_v29 = vmul.f32 1.442695, %v831_v1 }
 0x353   :  { %876 = vadd.xlane.f32.xlu0 %v1634_v27  ;;  %v805_v8 = vpop.xlane.xlu0 %804 }
 0x354   :  { %1203 = vpow2.f32 %v850_v29  ;;  %v832_v30 = vsub.f32 %v1542_v24, %v805_v8 }
 0x355   :  { %v807_v9 = vpop.xlane.xlu1 %806 }
 0x356   :  { %v1638_v34 = vpop.eup %1199  ;;  %v852_v35 = vmul.f32 1.442695, %v832_v30  ;;  %v833_v16 = vsub.f32 %v1547_v25, %v807_v9 }
 0x357   :  { %878 = vadd.xlane.f32.xlu1 %v1638_v34 }
 0x358   :  { %1205 = vpow2.f32 %v852_v35  ;;  %v854_v38 = vmul.f32 1.442695, %v833_v16 }
 0x35a   :  { %v1642_v17 = vpop.eup %1201  ;;  %1207 = vpow2.f32 %v854_v38 }
 0x35b   :  { %880 = vadd.xlane.f32.xlu0 %v1642_v17  ;;  %v809_v39 = vpop.xlane.xlu0 %808 }
 0x35c   :  { %v834_v43 = vsub.f32 %v1558_v32, %v809_v39 }
 0x35d   :  { %v811_v44 = vpop.xlane.xlu1 %810 }
 0x35e   :  { %v1646_v24 = vpop.eup %1203  ;;  %v856_v46 = vmul.f32 1.442695, %v834_v43  ;;  %v835_v47 = vsub.f32 %v1563_v33, %v811_v44  ;;  %v562_v43 = vsub.s32 1, %v1487_v61 }
 0x35f   :  { %882 = vadd.xlane.f32.xlu1 %v1646_v24 }
 0x360   :  { %1209 = vpow2.f32 %v856_v46  ;;  %v858_v25 = vmul.f32 1.442695, %v835_v47  ;;  %v1696_v46 = vrot.slane %v1493_v63, %v562_v43 }
 0x362   :  { %v1650_v51 = vpop.eup %1205  ;;  %1211 = vpow2.f32 %v858_v25  ;;  %v687_v61 = vadd.f32 %v1506_v7, %v1696_v46 }
 0x363   :  { %884 = vadd.xlane.f32.xlu0 %v1650_v51  ;;  %v813_v52 = vpop.xlane.xlu0 %812 }
 0x364   :  { %v1653_v54 = vpop.eup %1207  ;;  %v836_v32 = vsub.f32 %v1574_v41, %v813_v52  ;;  %v683_v52 = vadd.f32 %v1503_v4, %v1696_v46 }
 0x365   :  { %v815_v55 = vpop.xlane.xlu1 %814  ;;  %886 = vadd.xlane.f32.xlu1 %v1653_v54 }
 0x366   :  { %v860_v59 = vmul.f32 1.442695, %v836_v32  ;;  %v837_v33 = vsub.f32 %v1579_v42, %v815_v55 }
 0x368   :  { %1213 = vpow2.f32 %v860_v59  ;;  %v862_v60 = vmul.f32 1.442695, %v837_v33 }
 0x36a   :  { %v1658_v36 = vpop.eup %1209  ;;  %1215 = vpow2.f32 %v862_v60 }
 0x36b   :  { %888 = vadd.xlane.f32.xlu0 %v1658_v36  ;;  %v817_v2 = vpop.xlane.xlu0 %816 }
 0x36c   :  { %v1661_v10 = vpop.eup %1211  ;;  %v838_v11 = vsub.f32 %v1590_v49, %v817_v2 }
 0x36d   :  { %v819_v13 = vpop.xlane.xlu1 %818  ;;  %890 = vadd.xlane.f32.xlu1 %v1661_v10 }
 0x36e   :  { %v864_v41 = vmul.f32 1.442695, %v838_v11  ;;  %v839_v14 = vsub.f32 %v1595_v50, %v819_v13 }
 0x370   :  { %1217 = vpow2.f32 %v864_v41  ;;  %v866_v42 = vmul.f32 1.442695, %v839_v14 }
 0x372   :  { %v1666_v0 = vpop.eup %1213  ;;  %1219 = vpow2.f32 %v866_v42 }
 0x373   :  { %892 = vadd.xlane.f32.xlu0 %v1666_v0  ;;  %v821_v18 = vpop.xlane.xlu0 %820 }
 0x374   :  { %v1669_v19 = vpop.eup %1215  ;;  %v840_v21 = vsub.f32 %v1606_v57, %v821_v18 }
 0x375   :  { %v823_v22 = vpop.xlane.xlu1 %822  ;;  %894 = vadd.xlane.f32.xlu1 %v1669_v19 }
 0x376   :  { %v868_v49 = vmul.f32 1.442695, %v840_v21  ;;  %v841_v26 = vsub.f32 %v1611_v58, %v823_v22 }
 0x378   :  { %1221 = vpow2.f32 %v868_v49  ;;  %v870_v50 = vmul.f32 1.442695, %v841_v26  ;;  %v707_v49 = vadd.f32 %v1538_v23, %v1696_v46  ;;  %v713_v23 = vadd.f32 %v1551_v28, %v1696_v46 }
 0x37a   :  { %v1674_v1 = vpop.eup %1217  ;;  %1223 = vpow2.f32 %v870_v50 }
 0x37b   :  { %896 = vadd.xlane.f32.xlu0 %v1674_v1  ;;  %v825_v29 = vpop.xlane.xlu0 %824 }
 0x37c   :  { %v1677_v8 = vpop.eup %1219  ;;  %v842_v30 = vsub.f32 %v1622_v5, %v825_v29 }
 0x37d   :  { %v827_v9 = vpop.xlane.xlu1 %826  ;;  %898 = vadd.xlane.f32.xlu1 %v1677_v8 }
 0x37e   :  { %v872_v57 = vmul.f32 1.442695, %v842_v30  ;;  %v843_v35 = vsub.f32 %v1627_v6, %v827_v9  ;;  %v717_v9 = vadd.f32 %v1554_v31, %v1696_v46  ;;  %v723_v31 = vadd.f32 %v1567_v37, %v1696_v46 }
 0x380   :  { %1225 = vpow2.f32 %v872_v57  ;;  %v874_v58 = vmul.f32 1.442695, %v843_v35 }
 0x382   :  { %v1682_v16 = vpop.eup %1221  ;;  %1227 = vpow2.f32 %v874_v58 }
 0x383   :  { %900 = vadd.xlane.f32.xlu0 %v1682_v16 }
 0x384   :  { %v1685_v38 = vpop.eup %1223 }
 0x385   :  { %902 = vadd.xlane.f32.xlu1 %v1685_v38 }
 0x38a   :  { %v1688_v39 = vpop.eup %1225 }
 0x38b   :  { %904 = vadd.xlane.f32.xlu0 %v1688_v39 }
 0x38c   :  { %v1691_v5 = vpop.eup %1227 }
 0x38d   :  { %906 = vadd.xlane.f32.xlu1 %v1691_v5 }
 0x3e0   :  { %v877_v6 = vpop.xlane.xlu0 %876 }
 0x3e1   :  { %1229 = vrcp.f32 %v877_v6 }
 0x3e4   :  { %v879_v44 = vpop.xlane.xlu1 %878 }
 0x3e5   :  { %1231 = vrcp.f32 %v879_v44  ;;  %v727_v44 = vadd.f32 %v1570_v40, %v1696_v46  ;;  %v733_v40 = vadd.f32 %v1583_v45, %v1696_v46 }
 0x3e8   :  { %v881_v47 = vpop.xlane.xlu0 %880 }
 0x3e9   :  { %1233 = vrcp.f32 %v881_v47 }
 0x3eb   :  { %v1230_v25 = vpop.eup %1229 }
 0x3ec   :  { %v924_v32 = vmul.f32 %v1230_v25, %v1634_v27  ;;  %v883_v55 = vpop.xlane.xlu1 %882  ;;  %v693_v27 = vadd.f32 %v1519_v12, %v1696_v46 }
 0x3ed   :  { %1235 = vrcp.f32 %v883_v55 }
 0x3ee   :  { %v940_v59 = vadd.f32 %v924_v32, %v683_v52 }
 0x3ef   :  { %v1232_v33 = vpop.eup %1231 }
 0x3f0   :  { %956 = vst [vmem:[%s1798_s4] sm:$0xff] %v940_v59  ;;  %v925_v63 = vmul.f32 %v1232_v33, %v1638_v34  ;;  %v885_v60 = vpop.xlane.xlu0 %884  ;;  %v697_v34 = vadd.f32 %v1522_v15, %v1696_v46  ;;  %v737_v59 = vadd.f32 %v1586_v48, %v1696_v46  ;;  %v743_v48 = vadd.f32 %v1599_v53, %v1696_v46 }
 0x3f1   :  { %1237 = vrcp.f32 %v885_v60  ;;  %v753_v53 = vadd.f32 %v1615_v62, %v1696_v46 }
 0x3f2   :  { %v941_v2 = vadd.f32 %v925_v63, %v687_v61  ;;  %v887_v11 = vpop.xlane.xlu1 %886 }
 0x3f3   :  { %v1234_v4 = vpop.eup %1233  ;;  %1239 = vrcp.f32 %v887_v11  ;;  %v747_v11 = vadd.f32 %v1602_v56, %v1696_v46  ;;  %v757_v56 = vadd.f32 %v1618_v3, %v1696_v46 }
 0x3f4   :  { %957 = vst [vmem:[%s1798_s4 + $0x8] sm:$0xff] %v941_v2  ;;  %v926_v7 = vmul.f32 %v1234_v4, %v1642_v17  ;;  %v703_v17 = vadd.f32 %v1535_v20, %v1696_v46 }
 0x3f6   :  { %v942_v13 = vadd.f32 %v926_v7, %v693_v27 }
 0x3f7   :  { %v1236_v41 = vpop.eup %1235 }
 0x3f8   :  { %958 = vst [vmem:[%s1798_s4 + $0x10] sm:$0xff] %v942_v13  ;;  %v927_v14 = vmul.f32 %v1236_v41, %v1646_v24  ;;  %v889_v42 = vpop.xlane.xlu0 %888 }
 0x3f9   :  { %1241 = vrcp.f32 %v889_v42 }
 0x3fa   :  { %v943_v12 = vadd.f32 %v927_v14, %v697_v34  ;;  %v891_v18 = vpop.xlane.xlu1 %890 }
 0x3fb   :  { %v1238_v21 = vpop.eup %1237  ;;  %1243 = vrcp.f32 %v891_v18 }
 0x3fc   :  { %959 = vst [vmem:[%s1798_s4 + $0x18] sm:$0xff] %v943_v12  ;;  %v928_v15 = vmul.f32 %v1238_v21, %v1650_v51 }
 0x3fd   :  { %v1240_v22 = vpop.eup %1239 }
 0x3fe   :  { %v944_v24 = vadd.f32 %v928_v15, %v703_v17  ;;  %v929_v26 = vmul.f32 %v1240_v22, %v1653_v54 }
 0x400   :  { %960 = vst [vmem:[%s1798_s4 + $0x20] sm:$0xff] %v944_v24  ;;  %v945_v50 = vadd.f32 %v929_v26, %v707_v49  ;;  %v893_v29 = vpop.xlane.xlu0 %892 }
 0x401   :  { %1245 = vrcp.f32 %v893_v29 }
 0x402   :  { %961 = vst [vmem:[%s1798_s4 + $0x28] sm:$0xff] %v945_v50  ;;  %v895_v20 = vpop.xlane.xlu1 %894 }
 0x403   :  { %v1242_v51 = vpop.eup %1241  ;;  %1247 = vrcp.f32 %v895_v20 }
 0x404   :  { %v930_v30 = vmul.f32 %v1242_v51, %v1658_v36 }
 0x405   :  { %v1244_v54 = vpop.eup %1243 }
 0x406   :  { %v946_v57 = vadd.f32 %v930_v30, %v713_v23  ;;  %v931_v35 = vmul.f32 %v1244_v54, %v1661_v10 }
 0x408   :  { %962 = vst [vmem:[%s1798_s4 + $0x30] sm:$0xff] %v946_v57  ;;  %v947_v58 = vadd.f32 %v931_v35, %v717_v9  ;;  %v897_v6 = vpop.xlane.xlu0 %896 }
 0x409   :  { %1249 = vrcp.f32 %v897_v6 }
 0x40a   :  { %963 = vst [vmem:[%s1798_s4 + $0x38] sm:$0xff] %v947_v58  ;;  %v899_v28 = vpop.xlane.xlu1 %898 }
 0x40b   :  { %v1246_v36 = vpop.eup %1245  ;;  %1251 = vrcp.f32 %v899_v28 }
 0x40c   :  { %v932_v43 = vmul.f32 %v1246_v36, %v1666_v0 }
 0x40d   :  { %v1248_v10 = vpop.eup %1247 }
 0x40e   :  { %v948_v47 = vadd.f32 %v932_v43, %v723_v31  ;;  %v933_v25 = vmul.f32 %v1248_v10, %v1669_v19 }
 0x410   :  { %964 = vst [vmem:[%s1798_s4 + $0x40] sm:$0xff] %v948_v47  ;;  %v949_v52 = vadd.f32 %v933_v25, %v727_v44  ;;  %v901_v32 = vpop.xlane.xlu0 %900 }
 0x411   :  { %1253 = vrcp.f32 %v901_v32 }
 0x412   :  { %965 = vst [vmem:[%s1798_s4 + $0x48] sm:$0xff] %v949_v52  ;;  %v903_v37 = vpop.xlane.xlu1 %902 }
 0x413   :  { %v1250_v0 = vpop.eup %1249  ;;  %1255 = vrcp.f32 %v903_v37 }
 0x414   :  { %v934_v55 = vmul.f32 %v1250_v0, %v1674_v1 }
 0x415   :  { %v1252_v19 = vpop.eup %1251 }
 0x416   :  { %v950_v33 = vadd.f32 %v934_v55, %v733_v40  ;;  %v935_v61 = vmul.f32 %v1252_v19, %v1677_v8 }
 0x418   :  { %966 = vst [vmem:[%s1798_s4 + $0x50] sm:$0xff] %v950_v33  ;;  %v951_v63 = vadd.f32 %v935_v61, %v737_v59  ;;  %v905_v60 = vpop.xlane.xlu0 %904 }
 0x419   :  { %1257 = vrcp.f32 %v905_v60 }
 0x41a   :  { %967 = vst [vmem:[%s1798_s4 + $0x58] sm:$0xff] %v951_v63  ;;  %v907_v45 = vpop.xlane.xlu1 %906 }
 0x41b   :  { %v1254_v1 = vpop.eup %1253  ;;  %1259 = vrcp.f32 %v907_v45 }
 0x41c   :  { %v936_v2 = vmul.f32 %v1254_v1, %v1682_v16 }
 0x41d   :  { %v1256_v8 = vpop.eup %1255 }
 0x41e   :  { %v952_v4 = vadd.f32 %v936_v2, %v743_v48  ;;  %v937_v27 = vmul.f32 %v1256_v8, %v1685_v38 }
 0x420   :  { %968 = vst [vmem:[%s1798_s4 + $0x60] sm:$0xff] %v952_v4  ;;  %v953_v7 = vadd.f32 %v937_v27, %v747_v11 }
 0x422   :  { %969 = vst [vmem:[%s1798_s4 + $0x68] sm:$0xff] %v953_v7 }
 0x423   :  { %v1258_v13 = vpop.eup %1257 }
 0x424   :  { %v938_v16 = vmul.f32 %v1258_v13, %v1688_v39 }
 0x425   :  { %v1260_v41 = vpop.eup %1259 }
 0x426   :  { %v954_v38 = vadd.f32 %v938_v16, %v753_v53  ;;  %v939_v34 = vmul.f32 %v1260_v41, %v1691_v5 }
 0x428   :  { %970 = vst [vmem:[%s1798_s4 + $0x70] sm:$0xff] %v954_v38  ;;  %v955_v14 = vadd.f32 %v939_v34, %v757_v56 }
 0x42a   :  { %971 = vst [vmem:[%s1798_s4 + $0x78] sm:$0xff] %v955_v14 }

</bundles_post_ra>
